<compile_context>
chip_gen: v6e
topology: v6e:2x2x1
jax: 0.10.0
libtpu: 0.0.40
codegen_flags: <defaults>
</compile_context>

<pallas_src>
import jax
import jax.numpy as jnp
from jax import lax
from jax.experimental import pallas as pl
from jax.experimental.pallas import tpu as pltpu
import numpy as np


def _graph_update_kernel(idx_ref, mij_ref, xt_ref, eh_ref, nh_ref,
                         wblk_ref, wr_ref, bu_ref, br_ref, out_ref):
    # Per (batch, node-tile) blocks; the leading block dim of 1 is indexed away.
    idx_t = idx_ref[0]          # (K, Tn) i32   neighbor ids for this node tile
    mij_t = mij_ref[0]          # (K, Tn)       edge mask (transposed)
    xt = xt_ref[0]              # (K, N)        full X (transposed) for gather
    eh2 = eh_ref[0]             # (Tn, K*De)    edge embeddings, flattened K*De
    nh = nh_ref[0]              # (Tn, Dn)      node embeddings
    wblk = wblk_ref[...]        # (K, K*De)     block-diagonal W_update
    wr = wr_ref[...]            # (1, Dn)       W_refine row
    bu = bu_ref[0, 0]           # scalar biases from SMEM
    br = br_ref[0, 0]

    K, n_tile = idx_t.shape
    n_full = xt.shape[-1]

    # 1) Per-edge linear: dX[k, t] = edge_h[t, k, :] . wu   (one MXU matmul,
    #    contraction dim K*De, output lane dim Tn).
    dX = jnp.einsum("kc,tc->kt", wblk, eh2,
                    preferred_element_type=jnp.float32) + bu          # (K, Tn)

    # 2) Sigmoid gate * mask, normalized over the K neighbors (sublane axis).
    #    1/(1+exp(-x)) is safe: exp overflow -> inf -> sigmoid -> 0 exactly.
    sig = 1.0 / (1.0 + jnp.exp(-dX))
    w = sig * mij_t
    w = w / (jnp.sum(w, axis=0, keepdims=True) + 1e-6)                # (K, Tn)

    # 3) Gather X_neighbors[k, t] = X[idx[t, k], k] via a one-hot batched
    #    matmul on the MXU; the one-hot is bounded by the node tile.
    iota_m = lax.broadcasted_iota(jnp.int32, (K, n_tile, n_full), 2)
    onehot = (iota_m == idx_t[:, :, None]).astype(jnp.float32)        # (K, Tn, N)
    xnb = jnp.einsum("kxm,ktm->kxt", xt[:, None, :], onehot,
                     preferred_element_type=jnp.float32)[:, 0, :]     # (K, Tn)

    # 4) Weighted neighbor average -> (1, Tn), lane-dense.
    x_pred = jnp.sum(w * xnb, axis=0, keepdims=True)

    # 5) Unconstrained refinement W_refine(node_h) on the MXU.
    d_ref = jnp.einsum("xd,td->xt", wr, nh,
                       preferred_element_type=jnp.float32) + br       # (1, Tn)

    out_ref[0] = (x_pred + d_ref).astype(out_ref.dtype)

    # TODO(synk): 'local' and 'neighbor_global' branches of the PyTorch module
    # (not exercised by the default config method='neighbor') are not
    # implemented here.


@jax.jit
def graph_backbone_update(X, node_h, edge_h, edge_idx, mask_i, mask_ij,
                          wu, bu, wr, br):
    # mask_i is accepted for API parity; the PyTorch 'neighbor' forward never
    # uses it.
    del mask_i
    B, N, K = X.shape
    Dn = node_h.shape[-1]
    De = edge_h.shape[-1]

    # ---- layout prep (plain XLA, outside the kernel) -----------------------
    Xt = jnp.swapaxes(X, 1, 2)                              # (B, K, N)
    idx_t = jnp.swapaxes(edge_idx, 1, 2).astype(jnp.int32)  # (B, K, N)
    mij_t = jnp.swapaxes(mask_ij, 1, 2)                     # (B, K, N)
    eh2 = edge_h.reshape(B, N, K * De)                      # free reshape
    # Block-diagonal weight so the per-edge Linear(De,1) is ONE 2-D matmul:
    #   wblk[k, k'*De + d] = wu[d] * (k == k')
    wblk = jnp.kron(jnp.eye(K, dtype=jnp.float32), wu.reshape(1, De))  # (K, K*De)
    wr_row = wr.reshape(1, Dn).astype(jnp.float32)
    bu_s = bu.reshape(1, 1).astype(jnp.float32)
    br_s = br.reshape(1, 1).astype(jnp.float32)

    # Node-tile size: lane-dense 128 when possible.
    if N % 128 == 0:
        Tn = 128
    else:
        Tn = N  # TODO(synk): ragged N > 128 would need a masked last tile.
    NT = N // Tn

    out = pl.pallas_call(
        _graph_update_kernel,
        out_shape=jax.ShapeDtypeStruct((B, 1, N), jnp.float32),
        grid=(B, NT),
        in_specs=[
            pl.BlockSpec((1, K, Tn), lambda b, t: (b, 0, t)),       # edge_idx^T
            pl.BlockSpec((1, K, Tn), lambda b, t: (b, 0, t)),       # mask_ij^T
            pl.BlockSpec((1, K, N), lambda b, t: (b, 0, 0)),        # X^T (full N)
            pl.BlockSpec((1, Tn, K * De), lambda b, t: (b, t, 0)),  # edge_h flat
            pl.BlockSpec((1, Tn, Dn), lambda b, t: (b, t, 0)),      # node_h
            pl.BlockSpec((K, K * De), lambda b, t: (0, 0)),         # W_update
            pl.BlockSpec((1, Dn), lambda b, t: (0, 0)),             # W_refine
            pl.BlockSpec(memory_space=pltpu.MemorySpace.SMEM),      # bu scalar
            pl.BlockSpec(memory_space=pltpu.MemorySpace.SMEM),      # br scalar
        ],
        out_specs=pl.BlockSpec((1, 1, Tn), lambda b, t: (b, 0, t)),
        compiler_params=pltpu.CompilerParams(
            dimension_semantics=("parallel", "parallel"),
            vmem_limit_bytes=32 * 1024 * 1024),
    )(idx_t, mij_t, Xt, eh2, node_h, wblk, wr_row, bu_s, br_s)

    # (B, 1, N) -> (B, N, 1) is a free row-major reshape.
    return out.reshape(B, N, 1)


def reference_jax(X, node_h, edge_h, edge_idx, mask_ij, wu, bu, wr, br):
    dX = jnp.einsum("bnkd,d->bnk", edge_h, wu[0]) + bu[0, 0]
    w = jax.nn.sigmoid(dX) * mask_ij
    w = w / (w.sum(-1, keepdims=True) + 1e-6)
    X_nb = jnp.take_along_axis(X, edge_idx, axis=1)
    X_pred = (w * X_nb).sum(-1, keepdims=True)
    d_refine = jnp.einsum("bnd,d->bn", node_h, wr[0])[..., None] + br[0, 0]
    return X_pred + d_refine


if __name__ == "__main__":
    B, N, K = 2, 8, 8
    dim_nodes, dim_edges = 32, 16

    key = jax.random.PRNGKey(0)
    k1, k2, k3, k4, k5, k6, k7, k8, k9 = jax.random.split(key, 9)

    X = jax.random.normal(k1, (B, N, K), dtype=jnp.float32)
    node_h = jax.random.normal(k2, (B, N, dim_nodes), dtype=jnp.float32)
    edge_h = jax.random.normal(k3, (B, N, K, dim_edges), dtype=jnp.float32)
    edge_idx = jax.random.randint(k4, (B, N, K), 0, N, dtype=jnp.int32)
    mask_i = (jax.random.uniform(k5, (B, N)) > 0.1).astype(jnp.float32)
    mask_ij = (jax.random.uniform(k6, (B, N, K)) > 0.2).astype(jnp.float32)

    # Deterministic linear-layer params (PyTorch-style uniform init bounds).
    bound_u = 1.0 / np.sqrt(dim_edges)
    bound_r = 1.0 / np.sqrt(dim_nodes)
    wu = jax.random.uniform(k7, (1, dim_edges), jnp.float32, -bound_u, bound_u)
    bu = jax.random.uniform(k8, (1, 1), jnp.float32, -bound_u, bound_u)
    wr = jax.random.uniform(k9, (1, dim_nodes), jnp.float32, -bound_r, bound_r)
    br = jnp.full((1, 1), 0.01, dtype=jnp.float32)

    out = graph_backbone_update(X, node_h, edge_h, edge_idx, mask_i, mask_ij,
                                wu, bu, wr, br)
    out = jax.block_until_ready(out)

    ref = reference_jax(X, node_h, edge_h, edge_idx, mask_ij, wu, bu, wr, br)
    # Tolerance leaves headroom for the MXU's multi-pass decomposition of
    # f32 matmuls (accumulation is f32 via preferred_element_type).
    np.testing.assert_allclose(np.asarray(out), np.asarray(ref),
                               rtol=1e-3, atol=1e-3)

    print("KERNEL_OK")
</pallas_src>

<mosaic_0001>
module attributes {stable_mosaic.version = 11 : i64} {
  func.func @_graph_update_kernel(%arg0: i32, %arg1: i32, %arg2: memref<1x8x8xi32, #tpu.memory_space<vmem>>, %arg3: memref<1x8x8xf32, #tpu.memory_space<vmem>>, %arg4: memref<1x8x8xf32, #tpu.memory_space<vmem>>, %arg5: memref<1x8x128xf32, #tpu.memory_space<vmem>>, %arg6: memref<1x8x32xf32, #tpu.memory_space<vmem>>, %arg7: memref<8x128xf32, #tpu.memory_space<vmem>>, %arg8: memref<1x32xf32, #tpu.memory_space<vmem>>, %arg9: memref<1x1xf32, #tpu.memory_space<smem>>, %arg10: memref<1x1xf32, #tpu.memory_space<smem>>, %arg11: memref<1x1x8xf32, #tpu.memory_space<vmem>>) attributes {dimension_semantics = [#tpu.dimension_semantics<parallel>, #tpu.dimension_semantics<parallel>], iteration_bounds = array<i64: 2, 1>, scalar_prefetch = 0 : i64, scratch_operands = 0 : i64, tpu.core_type = #tpu.core_type<tc>, window_params = [{transform_indices = @transform_0, window_bounds = array<i64: 1, 8, 8>}, {transform_indices = @transform_1, window_bounds = array<i64: 1, 8, 8>}, {transform_indices = @transform_2, window_bounds = array<i64: 1, 8, 8>}, {transform_indices = @transform_3, window_bounds = array<i64: 1, 8, 128>}, {transform_indices = @transform_4, window_bounds = array<i64: 1, 8, 32>}, {pipeline_mode = #tpu.pipeline_mode<synchronous>, transform_indices = @transform_5, window_bounds = array<i64: 8, 128>}, {pipeline_mode = #tpu.pipeline_mode<synchronous>, transform_indices = @transform_6, window_bounds = array<i64: 1, 32>}, {transform_indices = @transform_7, window_bounds = array<i64: 1, 1>}, {transform_indices = @transform_8, window_bounds = array<i64: 1, 1>}, {transform_indices = @transform_9, window_bounds = array<i64: 1, 1, 8>}]} {
    %c0 = arith.constant 0 : index
    %c0_0 = arith.constant 0 : index
    %c0_1 = arith.constant 0 : index
    %0 = vector.load %arg2[%c0, %c0_0, %c0_1] : memref<1x8x8xi32, #tpu.memory_space<vmem>>, vector<1x8x8xi32>
    %1 = vector.shape_cast %0 : vector<1x8x8xi32> to vector<8x8xi32>
    %c0_2 = arith.constant 0 : index
    %c0_3 = arith.constant 0 : index
    %c0_4 = arith.constant 0 : index
    %2 = vector.load %arg3[%c0_2, %c0_3, %c0_4] : memref<1x8x8xf32, #tpu.memory_space<vmem>>, vector<1x8x8xf32>
    %3 = vector.shape_cast %2 : vector<1x8x8xf32> to vector<8x8xf32>
    %c0_5 = arith.constant 0 : index
    %c0_6 = arith.constant 0 : index
    %c0_7 = arith.constant 0 : index
    %4 = vector.load %arg4[%c0_5, %c0_6, %c0_7] : memref<1x8x8xf32, #tpu.memory_space<vmem>>, vector<1x8x8xf32>
    %5 = vector.shape_cast %4 : vector<1x8x8xf32> to vector<8x8xf32>
    %c0_8 = arith.constant 0 : index
    %c0_9 = arith.constant 0 : index
    %c0_10 = arith.constant 0 : index
    %6 = vector.load %arg5[%c0_8, %c0_9, %c0_10] : memref<1x8x128xf32, #tpu.memory_space<vmem>>, vector<1x8x128xf32>
    %7 = vector.shape_cast %6 : vector<1x8x128xf32> to vector<8x128xf32>
    %c0_11 = arith.constant 0 : index
    %c0_12 = arith.constant 0 : index
    %c0_13 = arith.constant 0 : index
    %8 = vector.load %arg6[%c0_11, %c0_12, %c0_13] : memref<1x8x32xf32, #tpu.memory_space<vmem>>, vector<1x8x32xf32>
    %9 = vector.shape_cast %8 : vector<1x8x32xf32> to vector<8x32xf32>
    %c0_14 = arith.constant 0 : index
    %c0_15 = arith.constant 0 : index
    %10 = vector.load %arg7[%c0_14, %c0_15] : memref<8x128xf32, #tpu.memory_space<vmem>>, vector<8x128xf32>
    %c0_16 = arith.constant 0 : index
    %c0_17 = arith.constant 0 : index
    %11 = vector.load %arg8[%c0_16, %c0_17] : memref<1x32xf32, #tpu.memory_space<vmem>>, vector<1x32xf32>
    %c0_18 = arith.constant 0 : index
    %c0_19 = arith.constant 0 : index
    %12 = memref.load %arg9[%c0_18, %c0_19] : memref<1x1xf32, #tpu.memory_space<smem>>
    %c0_20 = arith.constant 0 : index
    %c0_21 = arith.constant 0 : index
    %13 = memref.load %arg10[%c0_20, %c0_21] : memref<1x1xf32, #tpu.memory_space<smem>>
    "tpu.trace_start"() <{level = 10 : i32, message = "kc,tc->kt"}> : () -> ()
    %cst = arith.constant dense<0.000000e+00> : vector<8x8xf32>
    %14 = tpu.matmul %10, %7, %cst {dimension_numbers = #tpu.dot_dimension_numbers<[1], [1], [0], [0], [0, 0, 1, 0], [], []>} : vector<8x128xf32>, vector<8x128xf32>, vector<8x8xf32> -> vector<8x8xf32>
    "tpu.trace_stop"() : () -> ()
    %15 = vector.broadcast %12 : f32 to vector<8x8xf32>
    %16 = arith.addf %14, %15 : vector<8x8xf32>
    %cst_22 = arith.constant 0.000000e+00 : f32
    %17 = vector.broadcast %cst_22 : f32 to vector<8x8xf32>
    %18 = arith.subf %17, %16 : vector<8x8xf32>
    %19 = math.exp %18 : vector<8x8xf32>
    %cst_23 = arith.constant 1.000000e+00 : f32
    %20 = vector.broadcast %cst_23 : f32 to vector<8x8xf32>
    %21 = arith.addf %20, %19 : vector<8x8xf32>
    %cst_24 = arith.constant 1.000000e+00 : f32
    %22 = vector.broadcast %cst_24 : f32 to vector<8x8xf32>
    %23 = arith.divf %22, %21 : vector<8x8xf32>
    %24 = arith.mulf %23, %3 : vector<8x8xf32>
    %cst_25 = arith.constant dense<0.000000e+00> : vector<8xf32>
    %25 = vector.multi_reduction <add>, %24, %cst_25 [0] : vector<8x8xf32> to vector<8xf32>
    %26 = vector.shape_cast %25 : vector<8xf32> to vector<1x8xf32>
    %cst_26 = arith.constant 9.99999997E-7 : f32
    %27 = vector.broadcast %cst_26 : f32 to vector<1x8xf32>
    %28 = arith.addf %26, %27 : vector<1x8xf32>
    %29 = vector.broadcast %28 : vector<1x8xf32> to vector<8x8xf32>
    %30 = arith.divf %24, %29 : vector<8x8xf32>
    %31 = tpu.iota {dimensions = array<i32: 2>} : vector<8x8x8xi32>
    %32 = vector.shape_cast %1 : vector<8x8xi32> to vector<8x8x1xi32>
    %33 = vector.broadcast %32 : vector<8x8x1xi32> to vector<8x8x8xi32>
    %34 = arith.cmpi eq, %31, %33 : vector<8x8x8xi32>
    %35 = arith.extui %34 : vector<8x8x8xi1> to vector<8x8x8xi32>
    %36 = arith.sitofp %35 : vector<8x8x8xi32> to vector<8x8x8xf32>
    %37 = vector.shape_cast %5 : vector<8x8xf32> to vector<8x1x8xf32>
    "tpu.trace_start"() <{level = 10 : i32, message = "kxm,ktm->kxt"}> : () -> ()
    %cst_27 = arith.constant dense<0.000000e+00> : vector<8x1x8xf32>
    %38 = tpu.matmul %37, %36, %cst_27 {dimension_numbers = #tpu.dot_dimension_numbers<[2], [2], [1], [1], [0, 0, 0, 1, 1, 1], [0], [0]>} : vector<8x1x8xf32>, vector<8x8x8xf32>, vector<8x1x8xf32> -> vector<8x1x8xf32>
    "tpu.trace_stop"() : () -> ()
    %39 = vector.shape_cast %38 : vector<8x1x8xf32> to vector<8x8xf32>
    %40 = arith.mulf %30, %39 : vector<8x8xf32>
    %cst_28 = arith.constant dense<0.000000e+00> : vector<8xf32>
    %41 = vector.multi_reduction <add>, %40, %cst_28 [0] : vector<8x8xf32> to vector<8xf32>
    %42 = vector.shape_cast %41 : vector<8xf32> to vector<1x8xf32>
    "tpu.trace_start"() <{level = 10 : i32, message = "xd,td->xt"}> : () -> ()
    %cst_29 = arith.constant dense<0.000000e+00> : vector<1x8xf32>
    %43 = tpu.matmul %11, %9, %cst_29 {dimension_numbers = #tpu.dot_dimension_numbers<[1], [1], [0], [0], [0, 0, 1, 0], [], []>} : vector<1x32xf32>, vector<8x32xf32>, vector<1x8xf32> -> vector<1x8xf32>
    "tpu.trace_stop"() : () -> ()
    %44 = vector.broadcast %13 : f32 to vector<1x8xf32>
    %45 = arith.addf %43, %44 : vector<1x8xf32>
    %46 = arith.addf %42, %45 : vector<1x8xf32>
    %c0_30 = arith.constant 0 : index
    %c0_31 = arith.constant 0 : index
    %c0_32 = arith.constant 0 : index
    %47 = vector.load %arg11[%c0_30, %c0_31, %c0_32] : memref<1x1x8xf32, #tpu.memory_space<vmem>>, vector<1x1x8xf32>
    %48 = vector.shape_cast %47 : vector<1x1x8xf32> to vector<1x8xf32>
    %49 = vector.shape_cast %46 : vector<1x8xf32> to vector<1x1x8xf32>
    tpu.vector_store %arg11[%c0_30, %c0_31, %c0_32], %49 {strides = array<i32>} : memref<1x1x8xf32, #tpu.memory_space<vmem>>, vector<1x1x8xf32>,
    return
  }
  func.func @transform_0(%arg0: i32, %arg1: i32) -> (i32, i32, i32) {
    %c0_i32 = arith.constant 0 : i32
    %c0_i32_0 = arith.constant 0 : i32
    return %arg0, %c0_i32, %arg1 : i32, i32, i32
  }
  func.func @transform_1(%arg0: i32, %arg1: i32) -> (i32, i32, i32) {
    %c0_i32 = arith.constant 0 : i32
    %c0_i32_0 = arith.constant 0 : i32
    return %arg0, %c0_i32, %arg1 : i32, i32, i32
  }
  func.func @transform_2(%arg0: i32, %arg1: i32) -> (i32, i32, i32) {
    %c0_i32 = arith.constant 0 : i32
    %c0_i32_0 = arith.constant 0 : i32
    %c0_i32_1 = arith.constant 0 : i32
    return %arg0, %c0_i32, %c0_i32_0 : i32, i32, i32
  }
  func.func @transform_3(%arg0: i32, %arg1: i32) -> (i32, i32, i32) {
    %c0_i32 = arith.constant 0 : i32
    %c0_i32_0 = arith.constant 0 : i32
    return %arg0, %arg1, %c0_i32 : i32, i32, i32
  }
  func.func @transform_4(%arg0: i32, %arg1: i32) -> (i32, i32, i32) {
    %c0_i32 = arith.constant 0 : i32
    %c0_i32_0 = arith.constant 0 : i32
    return %arg0, %arg1, %c0_i32 : i32, i32, i32
  }
  func.func @transform_5(%arg0: i32, %arg1: i32) -> (i32, i32) {
    %c0_i32 = arith.constant 0 : i32
    %c0_i32_0 = arith.constant 0 : i32
    %c0_i32_1 = arith.constant 0 : i32
    return %c0_i32, %c0_i32_0 : i32, i32
  }
  func.func @transform_6(%arg0: i32, %arg1: i32) -> (i32, i32) {
    %c0_i32 = arith.constant 0 : i32
    %c0_i32_0 = arith.constant 0 : i32
    %c0_i32_1 = arith.constant 0 : i32
    return %c0_i32, %c0_i32_0 : i32, i32
  }
  func.func @transform_7(%arg0: i32, %arg1: i32) -> (i32, i32) {
    %c0_i32 = arith.constant 0 : i32
    %c0_i32_0 = arith.constant 0 : i32
    %c0_i32_1 = arith.constant 0 : i32
    return %c0_i32, %c0_i32_0 : i32, i32
  }
  func.func @transform_8(%arg0: i32, %arg1: i32) -> (i32, i32) {
    %c0_i32 = arith.constant 0 : i32
    %c0_i32_0 = arith.constant 0 : i32
    %c0_i32_1 = arith.constant 0 : i32
    return %c0_i32, %c0_i32_0 : i32, i32
  }
  func.func @transform_9(%arg0: i32, %arg1: i32) -> (i32, i32, i32) {
    %c0_i32 = arith.constant 0 : i32
    %c0_i32_0 = arith.constant 0 : i32
    return %arg0, %c0_i32, %arg1 : i32, i32, i32
  }
}

</mosaic_0001>

<bundles_post_ra>
// kernel: graph_backbone_update.1
= control target key start
LH: loop header
LB: loop body
LE: loop exit
PB: predicated region body
PF: predicated region fallthrough
CT: control target
= control target key end

     0   :  { %s2034_s0 = inlined_call_operand.vmem [shape: s32[2,8,8], index: 0, kind: input, shape index: {}]   ;;  %s2035_s1 = inlined_call_operand.vmem [shape: f32[2,8,8], index: 1, kind: input, shape index: {}]   ;;  %s2036_s2 = inlined_call_operand.vmem [shape: f32[2,8,8], index: 2, kind: input, shape index: {}]   ;;  %s2037_s3 = inlined_call_operand.vmem [shape: f32[2,8,128], index: 3, kind: input, shape index: {}]   ;;  %s2038_s4 = inlined_call_operand.vmem [shape: f32[2,8,32], index: 4, kind: input, shape index: {}]   ;;  %s2039_s5 = inlined_call_operand.vmem [shape: f32[8,128], index: 5, kind: input, shape index: {}]   ;;  %s2040_s6 = inlined_call_operand.vmem [shape: f32[1,32], index: 6, kind: input, shape index: {}]   ;;  %s2041_s7 = inlined_call_operand.<no memory space> [shape: f32[1,1], index: 7, kind: input, shape index: {}]   ;;  %s2042_s8 = inlined_call_operand.<no memory space> [shape: f32[1,1], index: 8, kind: input, shape index: {}]   ;;  %s2043_s9 = inlined_call_operand.hbm [shape: f32[2,1,8], index: 9, kind: output, shape index: {}]  }
   0x1   :  { %14 = sst [smem:[#allocation2]] %s2041_s7 }
   0x2   :  { %15 = sst [smem:[#allocation3]] %s2042_s8 }
   0x3   :  { %16 = vsyncpa [#allocation5], 0 }
   0x4   :  { %18 = vsyncpa [#allocation5 + $0x1], 0  ;;  %s1854_s13 = smov 0   ;;  %s1856_s14 = smov 0  }
   0x5   :  { %s1858_s15 = smov 0   ;;  %s1860_s16 = smov 0  }
   0x6   :  { %s1862_s17 = smov 0   ;;  %s1864_s18 = smov 0  }
   0x7 LB: > { %s1542_s7 = sadd.s32 4294967295, %s1792_s18   ;;  %s1543_s8 = sadd.s32 4294967294, %s1792_s18   ;;  %s1792_s18 = sphi %s1864_s18, %s24_s18   ;;  %s1788_s17 = sphi %s1862_s17, %s2050_s17   ;;  %s1784_s16 = sphi %s1860_s16, %s2049_s16   ;;  %s1780_s15 = sphi %s1858_s15, %s2048_s15   ;;  %s1776_s14 = sphi %s1856_s14, %s2047_s14   ;;  %s1772_s13 = sphi %s1854_s13, %s2046_s13  }
   0x8   : > { %s36_s19 = sadd.s32 1, %s1788_s17  ;;  %s267_s20 = sadd.s32 1, %s1780_s15 }
   0x9   : > { %p38_p0 = scmp.ge.s32.totalorder %s36_s19, 2  ;;  %p277_p1 = scmp.ne.s32.totalorder %s1780_s15, %s1776_s14 }
   0xa   : > { %p278_p2 = scmp.eq.s32.totalorder %s1542_s7, 1  ;;  %p283_p3 = scmp.ne.s32.totalorder %s1776_s14, %s1772_s13 }
   0xb   : > { %s2052_s19 = smov (%p38_p0, %s36_s19), 0  ;;  %p284_p5 = scmp.eq.s32.totalorder %s1543_s8, 1 }
   0xc   : > { %p1894_p4 = por %p278_p2, %p277_p1  ;;  %s262_s22 = ssub.s32 %s1788_s17, %s2052_s19 }
   0xd   : > { %p1546_p6 = scmp.ge.s32.totalorder %s1792_s18, 1  ;;  %p265_p7 = scmp.eq.s32.totalorder %s262_s22, 0 }
   0xe   : > { %p1901_p8 = por %p284_p5, %p283_p3  ;;  %p361_p9 = scmp.lt.s32.totalorder %s1792_s18, 3 }
   0xf   : > { %s1907_s24 = scalar_select %p265_p7, %s1780_s15, %s267_s20  }
  0x10   : > { %p362_p10 = pnand %p1546_p6, %p361_p9 }
  0x11   : > { %p423_p11 = scmp.lt.s32.totalorder (!%p362_p10), %s1784_s16, 1  ;;  %s462_s10 = sld [smem:[#allocation2]] (!%p362_p10) }
  0x12   : > { %365 = sbr.rel (%p362_p10) target bundleno = 393 (0x189), region = 56  ;;  %s421_s8 = sand.u32 (!%p362_p10), 1, %s1776_s14  }
  0x13   : > { %s1578_s20 = sshll.u32 (!%p362_p10), %s1784_s16, 4  ;;  %s1405_s30 = scalar_lea.sflag (!%p362_p10), [#allocation5], %s421_s8 }
  0x17   : > { %v553_v0 = vlaneseq  ;;  %v1794_v1 = vmov 0.0   ;;  %vm1795_vm0 = vmmov 0   ;;  %s424_s25 = scalar_select %p423_p11, %s1784_s16, 1  ;;  %v460_v11 = vld [vmem:[%s2039_s5] sm:$0xff]  ;;  %v1796_v22 = vmov 1966171168  }
  0x18   : > { %1601 = vmatprep.subr.mxu0 %v1794_v1  ;;  %1603 = vmatprep.mubr.msk.f32.mxu0 %vm1795_vm0, %v1794_v1  ;;  %v638_v23 = vunpack.c.l.s4 %v1796_v22  ;;  %vm542_vm1 = vcmask 64512   ;;  %vm1324_vm10 = vcmask 261120   ;;  %v461_v58 = vld [vmem:[%s2040_s6] sm:$0x1]  ;;  %v464_v61 = vstv %s462_s10 }
  0x19   : > { %v556_v2 = vshrl.u32 %v553_v0, 7  ;;  %1606 = vmatprep.subr.mxu1 %v1794_v1  ;;  %1608 = vmatprep.mubr.msk.f32.mxu1 %vm1795_vm0, %v1794_v1  ;;  %s1917_s26 = sshll.u32 %s424_s25, 3  ;;  %v554_v27 = vand.u32 127, %v553_v0  ;;  %vm1294_vm11 = vcmask 1041409   ;;  %vm1297_vm12 = vcmask 1042434  }
  0x1a   : > { %s429_s29 = scalar_lea.vmem %s2034_s0, %s1917_s26  ;;  %s447_s11 = scalar_lea.vmem %s2037_s3, %s1917_s26  ;;  %v639_v24 = vunpack.c.0.s8 %v638_v23  ;;  %vm1300_vm13 = vcmask 1043459   ;;  %vm1303_vm14 = vcmask 1044484   ;;  %vm1306_vm15 = vcmask 1045509  }
  0x1b   : > { %v557_v3 = vsub.s32 0, %v556_v2  ;;  %v571_v4 = vsub.s32 2, %v556_v2  ;;  %v564_v5 = vsub.s32 1, %v556_v2  ;;  %v578_v6 = vsub.s32 3, %v556_v2  ;;  %v455_v7 = vld [vmem:[%s429_s29] sm:$0xff]  ;;  %s440_s22 = scalar_lea.vmem %s2036_s2, %s1917_s26  ;;  %s454_s28 = scalar_lea.vmem %s2038_s4, %s1917_s26 }
  0x1c   : > { %v458_v8 = vld [vmem:[%s447_s11] sm:$0xff]  ;;  %v585_v14 = vsub.s32 4, %v556_v2  ;;  %v592_v15 = vsub.s32 5, %v556_v2  ;;  %v599_v18 = vsub.s32 6, %v556_v2  ;;  %v606_v19 = vsub.s32 7, %v556_v2  ;;  %s436_s7 = scalar_lea.vmem %s2035_s1, %s1917_s26  ;;  %s463_s26 = sld [smem:[#allocation3]] }
  0x1d   : > { %v558_v9 = vrot.slane %v455_v7, %v557_v3  ;;  %v572_v10 = vrot.slane %v455_v7, %v571_v4  ;;  %1602 = vmatpush3.xpose.msra.mxu0 %v458_v8  ;;  %v565_v12 = vrot.slane %v455_v7, %v564_v5  ;;  %v579_v13 = vrot.slane %v455_v7, %v578_v6  ;;  %v457_v26 = vld [vmem:[%s440_s22] sm:$0xff]  ;;  %s422_s22 = scalar_lea.vmem [#allocation4], %s421_s8  ;;  %s1416_s29 = scalar_lea.hbm %s2043_s9, %s1578_s20 }
  0x1e   : > { %1611 = vmatprep.subr.mxu0 %v1794_v1  ;;  %v586_v16 = vrot.slane %v455_v7, %v585_v14  ;;  %v593_v17 = vrot.slane %v455_v7, %v592_v15  ;;  %v600_v20 = vrot.slane %v455_v7, %v599_v18  ;;  %v607_v21 = vrot.slane %v455_v7, %v606_v19  ;;  %v459_v56 = vld [vmem:[%s454_s28] sm:$0xff]  ;;  %s1418_s25 = sshll.u32 %s422_s22, 4  ;;  %s1797_s11 = smov [#allocation4]   ;;  %s1419_s25 = int_to_ptr.vmem [resolvable:$true] %s1418_s25 }
  0x1f   : > { %560 = vbcast.lane.b32.xlu0 %v558_v9, 256  ;;  %574 = vbcast.lane.b32.xlu1 %v572_v10, 256  ;;  %v642_v25 = vsub.s32 %v639_v24, %v556_v2  ;;  %v636_v32 = vcombine.high %v457_v26, %v457_v26  ;;  %v456_v4 = vld [vmem:[%s436_s7] sm:$0xff]  ;;  %s1716_s10 = scalar_lea.vmem %s1419_s25, 16  ;;  %s1720_s12 = sshll.u32 %s1797_s11, 4  ;;  %s1721_s12 = int_to_ptr.vmem [resolvable:$false] %s1720_s12 }
  0x20   : > { %1604 = vmatmul.mubr.f32.vlgmr.msra.gmra.mxu0 %v460_v11  ;;  %p1717_p12 = scmp.ne.s32.totalorder %s1419_s25, %s1716_s10  ;;  %s1722_s16 = scalar_lea.vmem %s1721_s12, 32 }
  0x21   : > { %1613 = vmatprep.mubr.msk.f32.mxu0 %vm1795_vm0, %v1794_v1  ;;  %v643_v28 = vrot.slane %v457_v26, %v642_v25  ;;  %v650_v39 = vrot.slane %v636_v32, %v642_v25  ;;  %p1723_p1 = scmp.lt.s32.totalorder %s1419_s25, %s1721_s12  ;;  %p1724_p2 = scmp.lt.s32.totalorder %s1722_s16, %s1716_s10 }
  0x22   : > { %p1718_p13 = pnand %p1717_p12, %p1894_p4 }
  0x23   : > { %567 = vbcast.lane.b32.xlu0 %v565_v12, 256  ;;  %581 = vbcast.lane.b32.xlu1 %v579_v13, 256  ;;  %v651_v33 = vcombine.high %v643_v28, %v643_v28  ;;  %v659_v34 = vrot.slane %v643_v28, %v642_v25  ;;  %v666_v47 = vrot.slane %v650_v39, %v642_v25  ;;  %p1725_p3 = por %p1724_p2, %p1723_p1 }
  0x24   : > { %v652_v48 = vcombine.high %v650_v39, %v650_v39  ;;  %p1719_p0 = pneg %p1718_p13 }
  0x25   : > { %v681_v40 = vcombine.high %v659_v34, %v659_v34  ;;  %v673_v41 = vrot.slane %v651_v33, %v642_v25  ;;  %v682_v54 = vcombine.high %v666_v47, %v666_v47 }
  0x26   : > { %v680_v53 = vrot.slane %v652_v48, %v642_v25  ;;  %p1726_p5 = pnand %p1725_p3, %p1719_p0 }
  0x27   : > { %588 = vbcast.lane.b32.xlu0 %v586_v16, 256  ;;  %595 = vbcast.lane.b32.xlu1 %v593_v17, 256  ;;  %v683_v46 = vcombine.high %v673_v41, %v673_v41 }
  0x28   : > { %v684_v57 = vcombine.high %v680_v53, %v680_v53 }
  0x2b   : > { %602 = vbcast.lane.b32.xlu0 %v600_v20, 256  ;;  %609 = vbcast.lane.b32.xlu1 %v607_v21, 256 }
  0x91   : > { %v561_v29 = vpop.permute.xlu0 %560  ;;  %v575_v30 = vpop.permute.xlu1 %574 }
  0x92   : > { %vm611_vm2 = vcmp.eq.s32.totalorder %v554_v27, %v561_v29  ;;  %vm613_vm3 = vcmp.eq.s32.totalorder %v554_v27, %v575_v30 }
  0x93   : > { %v1552_v31 = vsel %vm611_vm2, 1.0, %v1794_v1  ;;  %v1554_v35 = vsel %vm613_vm3, 1.0, %v1794_v1  ;;  %vm1312_vm2 = vcmask 1047559   ;;  %vm1402_vm3 = vcmask 57344  }
  0x94   : > { %1607 = vmatpush3.xpose.msk.msra.mxu1 %vm542_vm1, %v1552_v31 }
  0x95   : > { %v568_v36 = vpop.permute.xlu0 %567  ;;  %1616 = vmatprep.subr.mxu1 %v1794_v1  ;;  %v582_v37 = vpop.permute.xlu1 %581 }
  0x96   : > { %vm612_vm4 = vcmp.eq.s32.totalorder %v554_v27, %v568_v36  ;;  %vm614_vm5 = vcmp.eq.s32.totalorder %v554_v27, %v582_v37 }
  0x97   : > { %v1553_v38 = vsel %vm612_vm4, 1.0, %v1794_v1  ;;  %1609 = vmatmul.mubr.msk.f32.vlgmr.msra.gmra.mxu1 %vm542_vm1, %v659_v34  ;;  %v1555_v42 = vsel %vm614_vm5, 1.0, %v1794_v1 }
  0x98   : > { %1612 = vmatpush3.xpose.msk.msra.mxu0 %vm542_vm1, %v1553_v38  ;;  %1617 = vmatpush3.xpose.msk.msra.mxu1 %vm542_vm1, %v1554_v35 }
  0x99   : > { %v589_v43 = vpop.permute.xlu0 %588  ;;  %1618 = vmatprep.mubr.msk.f32.mxu1 %vm1795_vm0, %v1794_v1  ;;  %1621 = vmatprep.subr.mxu0 %v1794_v1  ;;  %v596_v44 = vpop.permute.xlu1 %595 }
  0x9a   : > { %vm615_vm6 = vcmp.eq.s32.totalorder %v554_v27, %v589_v43  ;;  %1626 = vmatprep.subr.mxu1 %v1794_v1  ;;  %vm616_vm7 = vcmp.eq.s32.totalorder %v554_v27, %v596_v44 }
  0x9b   : > { %v1556_v45 = vsel %vm615_vm6, 1.0, %v1794_v1  ;;  %1614 = vmatmul.mubr.msk.f32.vlgmr.msra.gmra.mxu0 %vm542_vm1, %v673_v41  ;;  %1619 = vmatmul.mubr.msk.f32.vlgmr.msra.gmra.mxu1 %vm542_vm1, %v681_v40  ;;  %v1557_v49 = vsel %vm616_vm7, 1.0, %v1794_v1 }
  0x9c   : > { %1622 = vmatpush3.xpose.msk.msra.mxu0 %vm542_vm1, %v1555_v42  ;;  %1627 = vmatpush3.xpose.msk.msra.mxu1 %vm542_vm1, %v1556_v45 }
  0x9d   : > { %1623 = vmatprep.mubr.msk.f32.mxu0 %vm1795_vm0, %v1794_v1  ;;  %v603_v50 = vpop.permute.xlu0 %602  ;;  %1628 = vmatprep.mubr.msk.f32.mxu1 %vm1795_vm0, %v1794_v1  ;;  %v610_v51 = vpop.permute.xlu1 %609 }
  0x9e   : > { %vm617_vm8 = vcmp.eq.s32.totalorder %v554_v27, %v603_v50  ;;  %1631 = vmatprep.subr.mxu0 %v1794_v1  ;;  %1636 = vmatprep.subr.mxu1 %v1794_v1  ;;  %vm618_vm9 = vcmp.eq.s32.totalorder %v554_v27, %v610_v51 }
  0x9f   : > { %v1558_v52 = vsel %vm617_vm8, 1.0, %v1794_v1  ;;  %1624 = vmatmul.mubr.msk.f32.vlgmr.msra.gmra.mxu0 %vm542_vm1, %v683_v46  ;;  %1629 = vmatmul.mubr.msk.f32.vlgmr.msra.gmra.mxu1 %vm542_vm1, %v666_v47  ;;  %v1559_v55 = vsel %vm618_vm9, 1.0, %v1794_v1 }
  0xa0   : > { %1632 = vmatpush3.xpose.msk.msra.mxu0 %vm542_vm1, %v1557_v49  ;;  %1637 = vmatpush3.xpose.msk.msra.mxu1 %vm542_vm1, %v1558_v52 }
  0xa1   : > { %1633 = vmatprep.mubr.msk.f32.mxu0 %vm1795_vm0, %v1794_v1  ;;  %1638 = vmatprep.mubr.msk.f32.mxu1 %vm1795_vm0, %v1794_v1 }
  0xa2   : > { %1641 = vmatprep.subr.mxu0 %v1794_v1  ;;  %1646 = vmatprep.subr.mxu1 %v1794_v1 }
  0xa3   : > { %1634 = vmatmul.mubr.msk.f32.vlgmr.msra.gmra.mxu0 %vm542_vm1, %v680_v53  ;;  %1639 = vmatmul.mubr.msk.f32.vlgmr.msra.gmra.mxu1 %vm542_vm1, %v682_v54  ;;  %v1323_v53 = vstv %s463_s26 }
  0xa4   : > { %1642 = vmatpush3.xpose.msk.msra.mxu0 %vm542_vm1, %v1559_v55  ;;  %1643 = vmatprep.mubr.msk.f32.mxu0 %vm1795_vm0, %v1794_v1 }
  0xa5   : > { %1647 = vmatpush3.xpose.msk.msra.mxu1 %vm1324_vm10, %v459_v56  ;;  %1648 = vmatprep.mubr.msk.f32.mxu1 %vm1795_vm0, %v1794_v1  ;;  %vm1309_vm0 = vcmask 1046534  }
  0xa7   : > { %1644 = vmatmul.mubr.msk.f32.vlgmr.msra.gmra.mxu0 %vm542_vm1, %v684_v57 }
  0xa8   : > { %1649 = vmatmul.mubr.msk.f32.vlgmr.msra.gmra.mxu1 %vm1324_vm10, %v461_v58 }
  0xe0   : > { %v531_v59 = vpop.f32.mrf.mxu0 }
  0xe1   : > { %v532_v62 = vadd.f32 %v531_v59, %v464_v61 }
  0xe2   : > { %v1605_v60 = vpop.f32.mrf.mxu0 }
  0xe3   : > { %v535_v63 = vsub.f32 0.0, %v532_v62 }
  0xe5   : > { %v536_v0 = vmul.f32 1.442695, %v535_v63 }
  0xe7   : > { %1710 = vpow2.f32 %v536_v0 }
  0xf4   : > { %v1711_v2 = vpop.eup %1710 }
  0xf5   : > { %v538_v3 = vadd.f32 1.0, %v1711_v2 }
  0xf7   : > { %1712 = vrcp.f32 %v538_v3 }
 0x104   : > { %v1713_v1 = vpop.eup %1712 }
 0x105   : > { %v541_v5 = vmul.f32 %v1713_v1, %v456_v4 }
 0x107   : > { %v543_v6 = vsel %vm542_vm1, %v541_v5, 0.0 }
 0x108   : > { %v544_v7 = vrot.slane %v543_v6, 4 }
 0x10a   : > { %v545_v8 = vadd.f32 %v544_v7, %v543_v6 }
 0x10c   : > { %v546_v9 = vrot.slane %v545_v8, 2 }
 0x10e   : > { %v547_v10 = vadd.f32 %v546_v9, %v545_v8 }
 0x110   : > { %v548_v11 = vrot.slane %v547_v10, 1 }
 0x112   : > { %v549_v12 = vadd.f32 %v548_v11, %v547_v10 }
 0x114   : > { %v550_v13 = vadd.f32 1e-06, %v549_v12 }
 0x116   : > { %1714 = vrcp.f32 %v550_v13 }
 0x123   : > { %v1715_v38 = vpop.eup %1714 }
 0x124   : > { %v552_v44 = vmul.f32 %v1715_v38, %v541_v5 }
 0x157   : > { %v756_v14 = vpop.f32.mrf.mxu1 }
 0x159   : > { %v1610_v15 = vpop.f32.mrf.mxu1 }
 0x15b   : > { %v831_v16 = vpop.f32.mrf.mxu0  ;;  %v906_v17 = vpop.f32.mrf.mxu1 }
 0x15c   : > { %v1293_v18 = vrot.slane %v831_v16, 7  ;;  %v1296_v19 = vrot.slane %v906_v17, 6 }
 0x15d   : > { %v1615_v20 = vpop.f32.mrf.mxu0  ;;  %v1620_v21 = vpop.f32.mrf.mxu1 }
 0x15e   : > { %v1295_v22 = vsel %vm1294_vm11, %v1293_v18, %v756_v14 }
 0x15f   : > { %v981_v23 = vpop.f32.mrf.mxu0  ;;  %v1056_v24 = vpop.f32.mrf.mxu1  ;;  %v1298_v26 = vsel %vm1297_vm12, %v1296_v19, %v1295_v22 }
 0x160   : > { %v1299_v25 = vrot.slane %v981_v23, 5  ;;  %v1302_v27 = vrot.slane %v1056_v24, 4 }
 0x161   : > { %v1625_v28 = vpop.f32.mrf.mxu0  ;;  %v1630_v29 = vpop.f32.mrf.mxu1 }
 0x162   : > { %v1301_v30 = vsel %vm1300_vm13, %v1299_v25, %v1298_v26 }
 0x163   : > { %v1131_v31 = vpop.f32.mrf.mxu0  ;;  %v1206_v32 = vpop.f32.mrf.mxu1  ;;  %v1304_v34 = vsel %vm1303_vm14, %v1302_v27, %v1301_v30 }
 0x164   : > { %v1305_v33 = vrot.slane %v1131_v31, 3  ;;  %v1308_v35 = vrot.slane %v1206_v32, 2 }
 0x165   : > { %v1635_v36 = vpop.f32.mrf.mxu0  ;;  %v1640_v37 = vpop.f32.mrf.mxu1 }
 0x166   : > { %v1307_v39 = vsel %vm1306_vm15, %v1305_v33, %v1304_v34 }
 0x167   : > { %v1281_v40 = vpop.f32.mrf.mxu0  ;;  %v1310_v43 = vsel %vm1309_vm0, %v1308_v35, %v1307_v39 }
 0x168   : > { %v1311_v41 = vrot.slane %v1281_v40, 1  ;;  %v1397_v42 = vpop.f32.mrf.mxu1 }
 0x169   : > { %v1645_v45 = vpop.f32.mrf.mxu0  ;;  %v1398_v56 = vadd.f32 %v1397_v42, %v1323_v53 }
 0x16a   : > { %v1313_v46 = vsel %vm1312_vm2, %v1311_v41, %v1310_v43  ;;  %v1650_v47 = vpop.f32.mrf.mxu1 }
 0x16b   : > { %v1315_v48 = vmul.f32 %v1313_v46, %v552_v44 }
 0x16d   : > { %v1316_v49 = vsel %vm542_vm1, %v1315_v48, 0.0 }
 0x16e   : > { %v1317_v50 = vrot.slane %v1316_v49, 4 }
 0x170   : > { %v1318_v51 = vadd.f32 %v1317_v50, %v1316_v49 }
 0x172   : > { %v1319_v52 = vrot.slane %v1318_v51, 2 }
 0x174   : > { %v1320_v54 = vadd.f32 %v1319_v52, %v1318_v51 }
 0x176   : > { %v1321_v55 = vrot.slane %v1320_v54, 1 }
 0x178   : > { %v1322_v57 = vadd.f32 %v1321_v55, %v1320_v54 }
 0x17a   : > { %v1401_v58 = vadd.f32 %v1398_v56, %v1322_v57 }
 0x17c   : > { %1403 = vst.msk [vmem:[%s422_s22] sm:$0x1] %vm1402_vm3, %v1401_v58 }
 0x17d   : > { %1729 = shalt.err (!%p1726_p5)
}
 0x17e   : > { %s1730_s7 = scalar_lea.hbm %s1416_s29, 16  ;;  %s1734_s20 = scalar_lea.hbm %s2043_s9, 32 }
 0x17f   : > { %p1731_p6 = scmp.ne.s32.totalorder %s1416_s29, %s1730_s7  ;;  %p1735_p10 = scmp.lt.s32.totalorder %s1416_s29, %s2043_s9 }
 0x180   : > { %p1736_p11 = scmp.lt.s32.totalorder %s1734_s20, %s1730_s7 }
 0x181   : > { %p1732_p7 = pnand %p1731_p6, %p1894_p4 }
 0x182   : > { %p1737_p12 = por %p1736_p11, %p1735_p10 }
 0x183   : > { %p1733_p9 = pneg %p1732_p7 }
 0x185   : > { %p1738_p13 = pnand %p1737_p12, %p1733_p9 }
 0x187   : > { %1741 = shalt.err (!%p1738_p13)
}
 0x188   : > { %1651 = dma.vmem_to_hbm [thread:$0]  (%p1894_p4), %s1419_s25, 16, %s1416_s29, %s1405_s30  }
 0x189 PF: > { %p1657_p0 = scmp.ge.s32.totalorder %s1792_s18, 2  ;;  %s1430_s28 = sand.u32 1, %s1772_s13  }
 0x18a   : > { %s1431_s10 = scalar_lea.sflag [#allocation5], %s1430_s28 }
 0x18b   : > { %p1654_p1 = pnand %p1657_p0, %p1901_p8 }
 0x18d   : > { %p1655_p2 = pneg %p1654_p1 }
 0x18f   : > { %1767 = dma.done.wait (%p1655_p2), %s1431_s10, 16  }
 0x190   : > { %1769 = vsyncadd (%p1655_p2), %s1431_s10, 4294967280  ;;  %s24_s18 = sadd.s32 1, %s1792_s18   ;;  %s2046_s13 = smov %s1776_s14 }
 0x191   : > { %p21_p3 = scmp.ge.s32.totalorder %s24_s18, 4   ;;  %s2047_s14 = smov %s1780_s15 }
 0x192   : > { %s2048_s15 = smov %s1907_s24  ;;  %s2049_s16 = smov %s1788_s17 }
 0x193   : > { %s2050_s17 = smov %s2052_s19  ;;  %23 = sbr.rel (!%p21_p3) target bundleno = 7 (0x7), region = 103 }
 0x198   :  { %1435 = vsyncpa [#allocation5], 1 }
 0x199   :  { %1437 = vsyncpa [#allocation5 + $0x1], 1 }

</bundles_post_ra>
